<compile_context>
chip_gen: v7x
topology: tpu7x:2x2x1
jax: 0.10.0
libtpu: 0.0.40
codegen_flags: <defaults>
</compile_context>

<pallas_src>
import functools
import math

import jax
import jax.numpy as jnp
from jax.experimental import pallas as pl
from jax.experimental.pallas import tpu as pltpu


def _round_up(x, m):
    return ((x + m - 1) // m) * m


@functools.lru_cache(maxsize=None)
def _vmem_limit_bytes():
    cap = 64 * 1024 * 1024
    try:
        cap = int(pltpu.get_tpu_info().vmem_capacity_bytes)
    except Exception:
        pass
    # ~3/4 of physical VMEM: ~96 MiB on v5e/v6e (128 MiB), ~48 MiB on v7x (64 MiB).
    return min((cap * 3) // 4, 112 * 1024 * 1024)


def _cparams(n_parallel_axes=1):
    return pltpu.CompilerParams(
        dimension_semantics=("parallel",) * n_parallel_axes,
        vmem_limit_bytes=_vmem_limit_bytes())


# ----------------------------------------------------------------------------
# In-kernel helpers
# ----------------------------------------------------------------------------

def _row_mask(len_ref, T):
    """(T, 1) f32 padding mask built from x_lengths (SMEM scalar prefetch)."""
    length = len_ref[pl.program_id(0)]
    row = jax.lax.broadcasted_iota(jnp.int32, (T, 1), 0)
    return (row < length).astype(jnp.float32)


def _conv1d_same(xin, w_ref, b_row, T, pad_l, pad_r):
    """'same'-padded Conv1d along time (sublanes): K shifted MXU dots, f32 acc.

    xin: (T, cin) f32, w_ref: (K, cin, cout) bf16 ref, b_row: (1, cout) f32.
    """
    K = w_ref.shape[0]
    cin = xin.shape[1]
    cout = w_ref.shape[2]
    xp = xin
    if pad_l or pad_r:
        xp = jnp.concatenate(
            [jnp.zeros((pad_l, cin), jnp.float32), xin,
             jnp.zeros((pad_r, cin), jnp.float32)], axis=0)
    acc = jnp.zeros((T, cout), jnp.float32)
    for k in range(K):
        acc = acc + jax.lax.dot_general(
            jax.lax.slice(xp, (k, 0), (k + T, cin)).astype(jnp.bfloat16),
            w_ref[k], (((1,), (0,)), ((), ())),
            preferred_element_type=jnp.float32)
    return acc + b_row


def _add_layer_norm(x, y, g_row, b_row, eps):
    """LayerNorm(x + y) over channels; stats in f32."""
    s = x + y
    mean = jnp.mean(s, axis=-1, keepdims=True)
    var = jnp.mean(jnp.square(s - mean), axis=-1, keepdims=True)
    return (s - mean) * jax.lax.rsqrt(var + eps) * g_row + b_row


# ----------------------------------------------------------------------------
# Kernels
# ----------------------------------------------------------------------------

def _prenet_kernel(len_ref, x_ref, v_ref, pit_ref,
                   wx_ref, bx_ref, wv_ref, bv_ref, o_ref, *, K):
    """(pre(x) + hub(v) + pit) * mask  -> masked encoder input."""
    T = o_ref.shape[1]
    pad_l = (K - 1) // 2
    pad_r = K - 1 - pad_l
    mask = _row_mask(len_ref, T)
    out = (_conv1d_same(x_ref[0].astype(jnp.float32), wx_ref, bx_ref[...], T, pad_l, pad_r)
           + _conv1d_same(v_ref[0].astype(jnp.float32), wv_ref, bv_ref[...], T, pad_l, pad_r)
           + pit_ref[0].astype(jnp.float32))
    o_ref[0] = (out * mask).astype(o_ref.dtype)


def _attn_block_kernel(len_ref, x_ref, wqkv_ref, bqkv_ref, wo_ref, bo_ref,
                       g_ref, beta_ref, o_ref, *, n_heads, eps):
    """Fused: QKV GEMM + per-head SDPA + out-proj + residual + LayerNorm1."""
    T, H = o_ref.shape[1], o_ref.shape[2]
    dk = H // n_heads
    scale = 1.0 / math.sqrt(dk)
    length = len_ref[pl.program_id(0)]

    x = x_ref[0].astype(jnp.float32)                                  # (T, H)
    qkv = jax.lax.dot_general(                                        # (T, 3H) f32
        x.astype(jnp.bfloat16), wqkv_ref[...],
        (((1,), (0,)), ((), ())),
        preferred_element_type=jnp.float32) + bqkv_ref[...]

    qi = jax.lax.broadcasted_iota(jnp.int32, (T, T), 0)
    ki = jax.lax.broadcasted_iota(jnp.int32, (T, T), 1)
    valid = (qi < length) & (ki < length)   # == x_mask[:,None] * x_mask[None,:]

    # TODO(synk): window_size=4 relative-position bias of VITS MHA omitted.
    y = jnp.zeros((T, H), jnp.float32)
    for h in range(n_heads):                 # head-blocked qkv columns [q|k|v]
        base = 3 * dk * h
        q = (qkv[:, base:base + dk] * scale).astype(jnp.bfloat16)
        k = qkv[:, base + dk:base + 2 * dk].astype(jnp.bfloat16)
        v = qkv[:, base + 2 * dk:base + 3 * dk].astype(jnp.bfloat16)
        s = jax.lax.dot_general(q, k, (((1,), (1,)), ((), ())),
                                preferred_element_type=jnp.float32)
        s = jnp.where(valid, s, jnp.float32(-1e4))        # masked_fill(-1e4)
        s = s - jnp.max(s, axis=-1, keepdims=True)
        e = jnp.exp(s)
        p = e * pl.reciprocal(jnp.sum(e, axis=-1, keepdims=True), approx=True)
        o_h = jax.lax.dot_general(p.astype(jnp.bfloat16), v,
                                  (((1,), (0,)), ((), ())),
                                  preferred_element_type=jnp.float32)
        # Output projection decomposed per head: y += o_h @ wo[h*dk:(h+1)*dk].
        y = y + jax.lax.dot_general(o_h.astype(jnp.bfloat16),
                                    wo_ref[h * dk:(h + 1) * dk, :],
                                    (((1,), (0,)), ((), ())),
                                    preferred_element_type=jnp.float32)
    y = y + bo_ref[...]
    o_ref[0] = _add_layer_norm(x, y, g_ref[...], beta_ref[...], eps).astype(o_ref.dtype)


def _ffn_block_kernel(len_ref, x_ref, w1_ref, b1_ref, w2_ref, b2_ref,
                      g_ref, beta_ref, o_ref, *, K, eps):
    """Fused FFN: mask->conv->relu->mask->conv->mask + residual + LayerNorm2."""
    T = o_ref.shape[1]
    pad_l = (K - 1) // 2
    pad_r = K - 1 - pad_l
    mask = _row_mask(len_ref, T)

    x = x_ref[0].astype(jnp.float32)
    h1 = jnp.maximum(_conv1d_same(x * mask, w1_ref, b1_ref[...], T, pad_l, pad_r), 0.0)
    y = _conv1d_same(h1 * mask, w2_ref, b2_ref[...], T, pad_l, pad_r) * mask
    o_ref[0] = _add_layer_norm(x, y, g_ref[...], beta_ref[...], eps).astype(o_ref.dtype)


def _proj_z_kernel(len_ref, x_ref, noise_ref, w_ref, b_ref, slab_ref, xm_ref, *, C):
    """proj GEMM + stats split + z = (m + noise*exp(logs))*mask.

    Writes a lane-dense 128-wide slab [m | logs | z | 0...] and the masked
    encoder output.
    """
    T = xm_ref.shape[1]
    Np = slab_ref.shape[2]
    mask = _row_mask(len_ref, T)

    x = x_ref[0].astype(jnp.float32) * mask                 # encoder output * x_mask
    stats = (jax.lax.dot_general(x.astype(jnp.bfloat16), w_ref[...],
                                 (((1,), (0,)), ((), ())),
                                 preferred_element_type=jnp.float32)
             + b_ref[...]) * mask
    m = stats[:, :C]
    logs = stats[:, C:2 * C]
    z = (m + noise_ref[0].astype(jnp.float32) * jnp.exp(logs)) * mask
    slab = jnp.concatenate([m, logs, z], axis=-1)
    pad = Np - 3 * C
    if pad:
        slab = jnp.concatenate([slab, jnp.zeros((T, pad), jnp.float32)], axis=-1)
    slab_ref[0] = slab.astype(slab_ref.dtype)
    xm_ref[0] = x.astype(xm_ref.dtype)


# ----------------------------------------------------------------------------
# pallas_call wrappers (grid = (B,) parallel; x_lengths scalar-prefetched)
# ----------------------------------------------------------------------------

def _prenet(x, v, pit, lens, p):
    B, T, Cin = x.shape
    Cv = v.shape[2]
    H = pit.shape[2]
    K = p["pre_w"].shape[0]
    kernel = functools.partial(_prenet_kernel, K=K)
    return pl.pallas_call(
        kernel,
        out_shape=jax.ShapeDtypeStruct((B, T, H), x.dtype),
        grid_spec=pltpu.PrefetchScalarGridSpec(
            num_scalar_prefetch=1,
            grid=(B,),
            in_specs=[
                pl.BlockSpec((1, T, Cin), lambda b, L: (b, 0, 0)),
                pl.BlockSpec((1, T, Cv), lambda b, L: (b, 0, 0)),
                pl.BlockSpec((1, T, H), lambda b, L: (b, 0, 0)),
                pl.BlockSpec((K, Cin, H), lambda b, L: (0, 0, 0)),
                pl.BlockSpec((1, H), lambda b, L: (0, 0)),
                pl.BlockSpec((K, Cv, H), lambda b, L: (0, 0, 0)),
                pl.BlockSpec((1, H), lambda b, L: (0, 0)),
            ],
            out_specs=pl.BlockSpec((1, T, H), lambda b, L: (b, 0, 0)),
        ),
        compiler_params=_cparams(1),
    )(lens, x, v, pit, p["pre_w"], p["pre_b"], p["hub_w"], p["hub_b"])


def _attn_block(x, lens, lp, n_heads):
    B, T, H = x.shape
    kernel = functools.partial(_attn_block_kernel, n_heads=n_heads, eps=1e-5)
    return pl.pallas_call(
        kernel,
        out_shape=jax.ShapeDtypeStruct((B, T, H), x.dtype),
        grid_spec=pltpu.PrefetchScalarGridSpec(
            num_scalar_prefetch=1,
            grid=(B,),
            in_specs=[
                pl.BlockSpec((1, T, H), lambda b, L: (b, 0, 0)),
                pl.BlockSpec((H, 3 * H), lambda b, L: (0, 0)),
                pl.BlockSpec((1, 3 * H), lambda b, L: (0, 0)),
                pl.BlockSpec((H, H), lambda b, L: (0, 0)),
                pl.BlockSpec((1, H), lambda b, L: (0, 0)),
                pl.BlockSpec((1, H), lambda b, L: (0, 0)),
                pl.BlockSpec((1, H), lambda b, L: (0, 0)),
            ],
            out_specs=pl.BlockSpec((1, T, H), lambda b, L: (b, 0, 0)),
        ),
        compiler_params=_cparams(1),
    )(lens, x, lp["wqkv"], lp["bqkv"], lp["wo"], lp["bo"], lp["ln1_g"], lp["ln1_b"])


def _ffn_block(x, lens, lp):
    B, T, H = x.shape
    K, _, Fc = lp["ffn_w1"].shape
    kernel = functools.partial(_ffn_block_kernel, K=K, eps=1e-5)
    return pl.pallas_call(
        kernel,
        out_shape=jax.ShapeDtypeStruct((B, T, H), x.dtype),
        grid_spec=pltpu.PrefetchScalarGridSpec(
            num_scalar_prefetch=1,
            grid=(B,),
            in_specs=[
                pl.BlockSpec((1, T, H), lambda b, L: (b, 0, 0)),
                pl.BlockSpec((K, H, Fc), lambda b, L: (0, 0, 0)),
                pl.BlockSpec((1, Fc), lambda b, L: (0, 0)),
                pl.BlockSpec((K, Fc, H), lambda b, L: (0, 0, 0)),
                pl.BlockSpec((1, H), lambda b, L: (0, 0)),
                pl.BlockSpec((1, H), lambda b, L: (0, 0)),
                pl.BlockSpec((1, H), lambda b, L: (0, 0)),
            ],
            out_specs=pl.BlockSpec((1, T, H), lambda b, L: (b, 0, 0)),
        ),
        compiler_params=_cparams(1),
    )(lens, x, lp["ffn_w1"], lp["ffn_b1"], lp["ffn_w2"], lp["ffn_b2"],
      lp["ln2_g"], lp["ln2_b"])


def _proj_z(h, noise, lens, proj_w, proj_b, C):
    B, T, H = h.shape
    Np = _round_up(3 * C, 128)           # lane-dense output slab
    kernel = functools.partial(_proj_z_kernel, C=C)
    slab, xm = pl.pallas_call(
        kernel,
        out_shape=(jax.ShapeDtypeStruct((B, T, Np), h.dtype),
                   jax.ShapeDtypeStruct((B, T, H), h.dtype)),
        grid_spec=pltpu.PrefetchScalarGridSpec(
            num_scalar_prefetch=1,
            grid=(B,),
            in_specs=[
                pl.BlockSpec((1, T, H), lambda b, L: (b, 0, 0)),
                pl.BlockSpec((1, T, C), lambda b, L: (b, 0, 0)),
                pl.BlockSpec((H, 2 * C), lambda b, L: (0, 0)),
                pl.BlockSpec((1, 2 * C), lambda b, L: (0, 0)),
            ],
            out_specs=[pl.BlockSpec((1, T, Np), lambda b, L: (b, 0, 0)),
                       pl.BlockSpec((1, T, H), lambda b, L: (b, 0, 0))],
        ),
        compiler_params=_cparams(1),
    )(lens, h, noise, proj_w, proj_b)
    return slab, xm


# ----------------------------------------------------------------------------
# Forward
# ----------------------------------------------------------------------------

def text_encoder_forward(params, x, x_lengths, v, f0, noise):
    """x: (B,T,in), v: (B,T,vec), f0: (B,T) int32 in [0,256), x_lengths: (B,),
    noise: (B,T,out_channels) ~ N(0,1).  Returns (z, m, logs, x_mask, x_enc)
    in the PyTorch (B, C, T) convention."""
    B, T, _ = x.shape
    C = params["out_channels"]
    n_heads = params["n_heads"]
    lens = x_lengths.astype(jnp.int32)

    # commons.sequence_mask (tiny, plain JAX)
    x_mask = (jnp.arange(T)[None, :] < lens[:, None]).astype(x.dtype)  # (B, T)

    pit = params["pit_emb"][f0]            # embedding gather (plain-JAX glue)

    h = _prenet(x, v, pit, lens, params)   # (pre(x)+hub(v)+pit) * mask

    for lp in params["layers"]:
        h = _attn_block(h, lens, lp, n_heads)
        h = _ffn_block(h, lens, lp)

    slab, x_enc = _proj_z(h, noise, lens, params["proj_w"], params["proj_b"], C)
    m = slab[..., :C]
    logs = slab[..., C:2 * C]
    z = slab[..., 2 * C:3 * C]

    to_nct = lambda t: jnp.transpose(t, (0, 2, 1))
    return to_nct(z), to_nct(m), to_nct(logs), x_mask[:, None, :], to_nct(x_enc)


# ----------------------------------------------------------------------------
# Parameters (synthetic, shapes match the torch module) + kernel-layout prep
# ----------------------------------------------------------------------------

def init_params_raw(key, in_channels, vec_channels, out_channels, hidden,
                    filter_channels, n_heads, n_layers, kernel_size):
    keys = iter(jax.random.split(key, 8 + 8 * n_layers))

    def w(shape, scale=0.02):
        return scale * jax.random.normal(next(keys), shape, jnp.float32)

    zeros = lambda *s: jnp.zeros(s, jnp.float32)
    ones = lambda *s: jnp.ones(s, jnp.float32)

    # Conv1d weights stored as (K, Cin, Cout) == torch (Cout,Cin,K).transpose(2,1,0);
    # 1x1 conv / linear weights stored as (Cin, Cout) == torch weight.T.
    raw = dict(
        out_channels=out_channels, n_heads=n_heads,
        pre_w=w((5, in_channels, hidden)), pre_b=zeros(hidden),
        hub_w=w((5, vec_channels, hidden)), hub_b=zeros(hidden),
        pit_emb=w((256, hidden), 1.0),
        proj_w=w((hidden, 2 * out_channels)), proj_b=zeros(2 * out_channels),
        layers=[])
    for _ in range(n_layers):
        raw["layers"].append(dict(
            wq=w((hidden, hidden)), bq=zeros(hidden),
            wk=w((hidden, hidden)), bk=zeros(hidden),
            wv=w((hidden, hidden)), bv=zeros(hidden),
            wo=w((hidden, hidden)), bo=zeros(hidden),
            ln1_g=ones(hidden), ln1_b=zeros(hidden),
            ffn_w1=w((kernel_size, hidden, filter_channels)), ffn_b1=zeros(filter_channels),
            ffn_w2=w((kernel_size, filter_channels, hidden)), ffn_b2=zeros(hidden),
            ln2_g=ones(hidden), ln2_b=zeros(hidden)))
    return raw


def _fuse_qkv_headblocked(wq, wk, wv, bq, bk, bv, n_heads):
    """Fuse q/k/v into one (H, 3H) weight with head-blocked columns [q_h|k_h|v_h]."""
    H = wq.shape[0]
    dk = H // n_heads
    w_cols, b_cols = [], []
    for h in range(n_heads):
        sl = slice(h * dk, (h + 1) * dk)
        w_cols += [wq[:, sl], wk[:, sl], wv[:, sl]]
        b_cols += [bq[sl], bk[sl], bv[sl]]
    return jnp.concatenate(w_cols, axis=1), jnp.concatenate(b_cols)


def prepare_params(raw):
    """Kernel-ready params: bf16 MXU weights, (1,N) f32 biases/LN, fused QKV."""
    bf = lambda a: a.astype(jnp.bfloat16)
    row = lambda a: a.reshape(1, -1).astype(jnp.float32)
    p = dict(
        out_channels=raw["out_channels"], n_heads=raw["n_heads"],
        pre_w=bf(raw["pre_w"]), pre_b=row(raw["pre_b"]),
        hub_w=bf(raw["hub_w"]), hub_b=row(raw["hub_b"]),
        pit_emb=raw["pit_emb"],
        proj_w=bf(raw["proj_w"]), proj_b=row(raw["proj_b"]),
        layers=[])
    for lp in raw["layers"]:
        wqkv, bqkv = _fuse_qkv_headblocked(lp["wq"], lp["wk"], lp["wv"],
                                           lp["bq"], lp["bk"], lp["bv"],
                                           raw["n_heads"])
        p["layers"].append(dict(
            wqkv=bf(wqkv), bqkv=row(bqkv),
            wo=bf(lp["wo"]), bo=row(lp["bo"]),
            ln1_g=row(lp["ln1_g"]), ln1_b=row(lp["ln1_b"]),
            ffn_w1=bf(lp["ffn_w1"]), ffn_b1=row(lp["ffn_b1"]),
            ffn_w2=bf(lp["ffn_w2"]), ffn_b2=row(lp["ffn_b2"]),
            ln2_g=row(lp["ln2_g"]), ln2_b=row(lp["ln2_b"])))
    return p


# ----------------------------------------------------------------------------
# Main
# ----------------------------------------------------------------------------

if __name__ == "__main__":
    key = jax.random.PRNGKey(0)
    k_param, k_x, k_v, k_f0, k_noise = jax.random.split(key, 5)

    B, T = 2, 16
    in_channels, vec_channels = 8, 8
    hidden, filter_channels = 32, 64
    out_channels = 12
    n_heads, n_layers, kernel_size = 2, 2, 3   # p_dropout: eval-mode identity

    raw = init_params_raw(k_param, in_channels, vec_channels, out_channels,
                          hidden, filter_channels, n_heads, n_layers, kernel_size)
    params = prepare_params(raw)

    x = jax.random.normal(k_x, (B, T, in_channels), jnp.float32)
    v = jax.random.normal(k_v, (B, T, vec_channels), jnp.float32)
    f0 = jax.random.randint(k_f0, (B, T), 0, 256, jnp.int32)
    x_lengths = jnp.array([T, T - 5], jnp.int32)
    noise = jax.random.normal(k_noise, (B, T, out_channels), jnp.float32)

    z, m, logs, x_mask, x_enc = text_encoder_forward(params, x, x_lengths, v, f0, noise)
    jax.block_until_ready((z, m, logs, x_mask, x_enc))

    assert z.shape == (B, out_channels, T)
    assert m.shape == (B, out_channels, T)
    assert logs.shape == (B, out_channels, T)
    assert x_mask.shape == (B, 1, T)
    assert x_enc.shape == (B, hidden, T)
    assert bool(jnp.all(jnp.isfinite(z)))
    assert bool(jnp.all(jnp.isfinite(x_enc)))
    # padded positions must be zeroed exactly (masked semantics preserved)
    assert bool(jnp.all(z[1, :, T - 5:] == 0.0))
    print("KERNEL_OK")
</pallas_src>

<mosaic_0001>
module attributes {stable_mosaic.version = 11 : i64} {
  func.func @_prenet_kernel(%arg0: i32, %arg1: memref<2xi32, #tpu.memory_space<smem>>, %arg2: memref<1x16x8xf32, #tpu.memory_space<vmem>>, %arg3: memref<1x16x8xf32, #tpu.memory_space<vmem>>, %arg4: memref<1x16x32xf32, #tpu.memory_space<vmem>>, %arg5: memref<5x8x32xbf16, #tpu.memory_space<vmem>>, %arg6: memref<1x32xf32, #tpu.memory_space<vmem>>, %arg7: memref<5x8x32xbf16, #tpu.memory_space<vmem>>, %arg8: memref<1x32xf32, #tpu.memory_space<vmem>>, %arg9: memref<1x16x32xf32, #tpu.memory_space<vmem>>) attributes {dimension_semantics = [#tpu.dimension_semantics<parallel>], iteration_bounds = array<i64: 2>, scalar_prefetch = 1 : i64, scratch_operands = 0 : i64, tpu.core_type = #tpu.core_type<tc>, window_params = [{transform_indices = @transform_0, window_bounds = array<i64: 1, 16, 8>}, {transform_indices = @transform_1, window_bounds = array<i64: 1, 16, 8>}, {transform_indices = @transform_2, window_bounds = array<i64: 1, 16, 32>}, {pipeline_mode = #tpu.pipeline_mode<synchronous>, transform_indices = @transform_3, window_bounds = array<i64: 5, 8, 32>}, {pipeline_mode = #tpu.pipeline_mode<synchronous>, transform_indices = @transform_4, window_bounds = array<i64: 1, 32>}, {pipeline_mode = #tpu.pipeline_mode<synchronous>, transform_indices = @transform_5, window_bounds = array<i64: 5, 8, 32>}, {pipeline_mode = #tpu.pipeline_mode<synchronous>, transform_indices = @transform_6, window_bounds = array<i64: 1, 32>}, {transform_indices = @transform_7, window_bounds = array<i64: 1, 16, 32>}]} {
    %0 = arith.index_cast %arg0 : i32 to index
    %1 = memref.load %arg1[%0] : memref<2xi32, #tpu.memory_space<smem>>
    %2 = tpu.iota {dimensions = array<i32: 0>} : vector<16x1xi32>
    %3 = vector.broadcast %1 : i32 to vector<16x1xi32>
    %4 = arith.cmpi slt, %2, %3 : vector<16x1xi32>
    %5 = arith.extui %4 : vector<16x1xi1> to vector<16x1xi32>
    %6 = arith.sitofp %5 : vector<16x1xi32> to vector<16x1xf32>
    %c0 = arith.constant 0 : index
    %c0_0 = arith.constant 0 : index
    %c0_1 = arith.constant 0 : index
    %7 = vector.load %arg2[%c0, %c0_0, %c0_1] : memref<1x16x8xf32, #tpu.memory_space<vmem>>, vector<1x16x8xf32>
    %8 = vector.shape_cast %7 : vector<1x16x8xf32> to vector<16x8xf32>
    %c0_2 = arith.constant 0 : index
    %c0_3 = arith.constant 0 : index
    %9 = vector.load %arg6[%c0_2, %c0_3] : memref<1x32xf32, #tpu.memory_space<vmem>>, vector<1x32xf32>
    %cst = arith.constant 0.000000e+00 : f32
    %10 = vector.broadcast %cst : f32 to vector<2x8xf32>
    %cst_4 = arith.constant 0.000000e+00 : f32
    %11 = vector.broadcast %cst_4 : f32 to vector<2x8xf32>
    %12 = tpu.concatenate %10, %8, %11 in 0 : vector<2x8xf32>, vector<16x8xf32>, vector<2x8xf32> -> vector<20x8xf32>
    %cst_5 = arith.constant 0.000000e+00 : f32
    %13 = vector.broadcast %cst_5 : f32 to vector<16x32xf32>
    %14 = vector.extract_strided_slice %12 {offsets = [0, 0], sizes = [16, 8], strides = [1, 1]} : vector<20x8xf32> to vector<16x8xf32>
    %15 = arith.truncf %14 : vector<16x8xf32> to vector<16x8xbf16>
    %c0_6 = arith.constant 0 : index
    %c0_7 = arith.constant 0 : index
    %c0_8 = arith.constant 0 : index
    %16 = vector.load %arg5[%c0_6, %c0_7, %c0_8] : memref<5x8x32xbf16, #tpu.memory_space<vmem>>, vector<1x8x32xbf16>
    %17 = vector.shape_cast %16 : vector<1x8x32xbf16> to vector<8x32xbf16>
    %cst_9 = arith.constant dense<0.000000e+00> : vector<16x32xf32>
    %18 = tpu.matmul %15, %17, %cst_9 {dimension_numbers = #tpu.dot_dimension_numbers<[1], [0], [0], [1], [0, 0, 1, 1], [], []>} : vector<16x8xbf16>, vector<8x32xbf16>, vector<16x32xf32> -> vector<16x32xf32>
    %19 = arith.addf %13, %18 : vector<16x32xf32>
    %20 = vector.extract_strided_slice %12 {offsets = [1, 0], sizes = [16, 8], strides = [1, 1]} : vector<20x8xf32> to vector<16x8xf32>
    %21 = arith.truncf %20 : vector<16x8xf32> to vector<16x8xbf16>
    %c1 = arith.constant 1 : index
    %c0_10 = arith.constant 0 : index
    %c0_11 = arith.constant 0 : index
    %22 = vector.load %arg5[%c1, %c0_10, %c0_11] : memref<5x8x32xbf16, #tpu.memory_space<vmem>>, vector<1x8x32xbf16>
    %23 = vector.shape_cast %22 : vector<1x8x32xbf16> to vector<8x32xbf16>
    %cst_12 = arith.constant dense<0.000000e+00> : vector<16x32xf32>
    %24 = tpu.matmul %21, %23, %cst_12 {dimension_numbers = #tpu.dot_dimension_numbers<[1], [0], [0], [1], [0, 0, 1, 1], [], []>} : vector<16x8xbf16>, vector<8x32xbf16>, vector<16x32xf32> -> vector<16x32xf32>
    %25 = arith.addf %19, %24 : vector<16x32xf32>
    %26 = vector.extract_strided_slice %12 {offsets = [2, 0], sizes = [16, 8], strides = [1, 1]} : vector<20x8xf32> to vector<16x8xf32>
    %27 = arith.truncf %26 : vector<16x8xf32> to vector<16x8xbf16>
    %c2 = arith.constant 2 : index
    %c0_13 = arith.constant 0 : index
    %c0_14 = arith.constant 0 : index
    %28 = vector.load %arg5[%c2, %c0_13, %c0_14] : memref<5x8x32xbf16, #tpu.memory_space<vmem>>, vector<1x8x32xbf16>
    %29 = vector.shape_cast %28 : vector<1x8x32xbf16> to vector<8x32xbf16>
    %cst_15 = arith.constant dense<0.000000e+00> : vector<16x32xf32>
    %30 = tpu.matmul %27, %29, %cst_15 {dimension_numbers = #tpu.dot_dimension_numbers<[1], [0], [0], [1], [0, 0, 1, 1], [], []>} : vector<16x8xbf16>, vector<8x32xbf16>, vector<16x32xf32> -> vector<16x32xf32>
    %31 = arith.addf %25, %30 : vector<16x32xf32>
    %32 = vector.extract_strided_slice %12 {offsets = [3, 0], sizes = [16, 8], strides = [1, 1]} : vector<20x8xf32> to vector<16x8xf32>
    %33 = arith.truncf %32 : vector<16x8xf32> to vector<16x8xbf16>
    %c3 = arith.constant 3 : index
    %c0_16 = arith.constant 0 : index
    %c0_17 = arith.constant 0 : index
    %34 = vector.load %arg5[%c3, %c0_16, %c0_17] : memref<5x8x32xbf16, #tpu.memory_space<vmem>>, vector<1x8x32xbf16>
    %35 = vector.shape_cast %34 : vector<1x8x32xbf16> to vector<8x32xbf16>
    %cst_18 = arith.constant dense<0.000000e+00> : vector<16x32xf32>
    %36 = tpu.matmul %33, %35, %cst_18 {dimension_numbers = #tpu.dot_dimension_numbers<[1], [0], [0], [1], [0, 0, 1, 1], [], []>} : vector<16x8xbf16>, vector<8x32xbf16>, vector<16x32xf32> -> vector<16x32xf32>
    %37 = arith.addf %31, %36 : vector<16x32xf32>
    %38 = vector.extract_strided_slice %12 {offsets = [4, 0], sizes = [16, 8], strides = [1, 1]} : vector<20x8xf32> to vector<16x8xf32>
    %39 = arith.truncf %38 : vector<16x8xf32> to vector<16x8xbf16>
    %c4 = arith.constant 4 : index
    %c0_19 = arith.constant 0 : index
    %c0_20 = arith.constant 0 : index
    %40 = vector.load %arg5[%c4, %c0_19, %c0_20] : memref<5x8x32xbf16, #tpu.memory_space<vmem>>, vector<1x8x32xbf16>
    %41 = vector.shape_cast %40 : vector<1x8x32xbf16> to vector<8x32xbf16>
    %cst_21 = arith.constant dense<0.000000e+00> : vector<16x32xf32>
    %42 = tpu.matmul %39, %41, %cst_21 {dimension_numbers = #tpu.dot_dimension_numbers<[1], [0], [0], [1], [0, 0, 1, 1], [], []>} : vector<16x8xbf16>, vector<8x32xbf16>, vector<16x32xf32> -> vector<16x32xf32>
    %43 = arith.addf %37, %42 : vector<16x32xf32>
    %44 = vector.broadcast %9 : vector<1x32xf32> to vector<16x32xf32>
    %45 = arith.addf %43, %44 : vector<16x32xf32>
    %c0_22 = arith.constant 0 : index
    %c0_23 = arith.constant 0 : index
    %c0_24 = arith.constant 0 : index
    %46 = vector.load %arg3[%c0_22, %c0_23, %c0_24] : memref<1x16x8xf32, #tpu.memory_space<vmem>>, vector<1x16x8xf32>
    %47 = vector.shape_cast %46 : vector<1x16x8xf32> to vector<16x8xf32>
    %c0_25 = arith.constant 0 : index
    %c0_26 = arith.constant 0 : index
    %48 = vector.load %arg8[%c0_25, %c0_26] : memref<1x32xf32, #tpu.memory_space<vmem>>, vector<1x32xf32>
    %cst_27 = arith.constant 0.000000e+00 : f32
    %49 = vector.broadcast %cst_27 : f32 to vector<2x8xf32>
    %cst_28 = arith.constant 0.000000e+00 : f32
    %50 = vector.broadcast %cst_28 : f32 to vector<2x8xf32>
    %51 = tpu.concatenate %49, %47, %50 in 0 : vector<2x8xf32>, vector<16x8xf32>, vector<2x8xf32> -> vector<20x8xf32>
    %cst_29 = arith.constant 0.000000e+00 : f32
    %52 = vector.broadcast %cst_29 : f32 to vector<16x32xf32>
    %53 = vector.extract_strided_slice %51 {offsets = [0, 0], sizes = [16, 8], strides = [1, 1]} : vector<20x8xf32> to vector<16x8xf32>
    %54 = arith.truncf %53 : vector<16x8xf32> to vector<16x8xbf16>
    %c0_30 = arith.constant 0 : index
    %c0_31 = arith.constant 0 : index
    %c0_32 = arith.constant 0 : index
    %55 = vector.load %arg7[%c0_30, %c0_31, %c0_32] : memref<5x8x32xbf16, #tpu.memory_space<vmem>>, vector<1x8x32xbf16>
    %56 = vector.shape_cast %55 : vector<1x8x32xbf16> to vector<8x32xbf16>
    %cst_33 = arith.constant dense<0.000000e+00> : vector<16x32xf32>
    %57 = tpu.matmul %54, %56, %cst_33 {dimension_numbers = #tpu.dot_dimension_numbers<[1], [0], [0], [1], [0, 0, 1, 1], [], []>} : vector<16x8xbf16>, vector<8x32xbf16>, vector<16x32xf32> -> vector<16x32xf32>
    %58 = arith.addf %52, %57 : vector<16x32xf32>
    %59 = vector.extract_strided_slice %51 {offsets = [1, 0], sizes = [16, 8], strides = [1, 1]} : vector<20x8xf32> to vector<16x8xf32>
    %60 = arith.truncf %59 : vector<16x8xf32> to vector<16x8xbf16>
    %c1_34 = arith.constant 1 : index
    %c0_35 = arith.constant 0 : index
    %c0_36 = arith.constant 0 : index
    %61 = vector.load %arg7[%c1_34, %c0_35, %c0_36] : memref<5x8x32xbf16, #tpu.memory_space<vmem>>, vector<1x8x32xbf16>
    %62 = vector.shape_cast %61 : vector<1x8x32xbf16> to vector<8x32xbf16>
    %cst_37 = arith.constant dense<0.000000e+00> : vector<16x32xf32>
    %63 = tpu.matmul %60, %62, %cst_37 {dimension_numbers = #tpu.dot_dimension_numbers<[1], [0], [0], [1], [0, 0, 1, 1], [], []>} : vector<16x8xbf16>, vector<8x32xbf16>, vector<16x32xf32> -> vector<16x32xf32>
    %64 = arith.addf %58, %63 : vector<16x32xf32>
    %65 = vector.extract_strided_slice %51 {offsets = [2, 0], sizes = [16, 8], strides = [1, 1]} : vector<20x8xf32> to vector<16x8xf32>
    %66 = arith.truncf %65 : vector<16x8xf32> to vector<16x8xbf16>
    %c2_38 = arith.constant 2 : index
    %c0_39 = arith.constant 0 : index
    %c0_40 = arith.constant 0 : index
    %67 = vector.load %arg7[%c2_38, %c0_39, %c0_40] : memref<5x8x32xbf16, #tpu.memory_space<vmem>>, vector<1x8x32xbf16>
    %68 = vector.shape_cast %67 : vector<1x8x32xbf16> to vector<8x32xbf16>
    %cst_41 = arith.constant dense<0.000000e+00> : vector<16x32xf32>
    %69 = tpu.matmul %66, %68, %cst_41 {dimension_numbers = #tpu.dot_dimension_numbers<[1], [0], [0], [1], [0, 0, 1, 1], [], []>} : vector<16x8xbf16>, vector<8x32xbf16>, vector<16x32xf32> -> vector<16x32xf32>
    %70 = arith.addf %64, %69 : vector<16x32xf32>
    %71 = vector.extract_strided_slice %51 {offsets = [3, 0], sizes = [16, 8], strides = [1, 1]} : vector<20x8xf32> to vector<16x8xf32>
    %72 = arith.truncf %71 : vector<16x8xf32> to vector<16x8xbf16>
    %c3_42 = arith.constant 3 : index
    %c0_43 = arith.constant 0 : index
    %c0_44 = arith.constant 0 : index
    %73 = vector.load %arg7[%c3_42, %c0_43, %c0_44] : memref<5x8x32xbf16, #tpu.memory_space<vmem>>, vector<1x8x32xbf16>
    %74 = vector.shape_cast %73 : vector<1x8x32xbf16> to vector<8x32xbf16>
    %cst_45 = arith.constant dense<0.000000e+00> : vector<16x32xf32>
    %75 = tpu.matmul %72, %74, %cst_45 {dimension_numbers = #tpu.dot_dimension_numbers<[1], [0], [0], [1], [0, 0, 1, 1], [], []>} : vector<16x8xbf16>, vector<8x32xbf16>, vector<16x32xf32> -> vector<16x32xf32>
    %76 = arith.addf %70, %75 : vector<16x32xf32>
    %77 = vector.extract_strided_slice %51 {offsets = [4, 0], sizes = [16, 8], strides = [1, 1]} : vector<20x8xf32> to vector<16x8xf32>
    %78 = arith.truncf %77 : vector<16x8xf32> to vector<16x8xbf16>
    %c4_46 = arith.constant 4 : index
    %c0_47 = arith.constant 0 : index
    %c0_48 = arith.constant 0 : index
    %79 = vector.load %arg7[%c4_46, %c0_47, %c0_48] : memref<5x8x32xbf16, #tpu.memory_space<vmem>>, vector<1x8x32xbf16>
    %80 = vector.shape_cast %79 : vector<1x8x32xbf16> to vector<8x32xbf16>
    %cst_49 = arith.constant dense<0.000000e+00> : vector<16x32xf32>
    %81 = tpu.matmul %78, %80, %cst_49 {dimension_numbers = #tpu.dot_dimension_numbers<[1], [0], [0], [1], [0, 0, 1, 1], [], []>} : vector<16x8xbf16>, vector<8x32xbf16>, vector<16x32xf32> -> vector<16x32xf32>
    %82 = arith.addf %76, %81 : vector<16x32xf32>
    %83 = vector.broadcast %48 : vector<1x32xf32> to vector<16x32xf32>
    %84 = arith.addf %82, %83 : vector<16x32xf32>
    %85 = arith.addf %45, %84 : vector<16x32xf32>
    %c0_50 = arith.constant 0 : index
    %c0_51 = arith.constant 0 : index
    %c0_52 = arith.constant 0 : index
    %86 = vector.load %arg4[%c0_50, %c0_51, %c0_52] : memref<1x16x32xf32, #tpu.memory_space<vmem>>, vector<1x16x32xf32>
    %87 = vector.shape_cast %86 : vector<1x16x32xf32> to vector<16x32xf32>
    %88 = arith.addf %85, %87 : vector<16x32xf32>
    %89 = vector.broadcast %6 : vector<16x1xf32> to vector<16x32xf32>
    %90 = arith.mulf %88, %89 : vector<16x32xf32>
    %c0_53 = arith.constant 0 : index
    %c0_54 = arith.constant 0 : index
    %c0_55 = arith.constant 0 : index
    %91 = vector.load %arg9[%c0_53, %c0_54, %c0_55] : memref<1x16x32xf32, #tpu.memory_space<vmem>>, vector<1x16x32xf32>
    %92 = vector.shape_cast %91 : vector<1x16x32xf32> to vector<16x32xf32>
    %93 = vector.shape_cast %90 : vector<16x32xf32> to vector<1x16x32xf32>
    tpu.vector_store %arg9[%c0_53, %c0_54, %c0_55], %93 {strides = array<i32>} : memref<1x16x32xf32, #tpu.memory_space<vmem>>, vector<1x16x32xf32>,
    return
  }
  func.func @transform_0(%arg0: i32, %arg1: memref<2xi32, #tpu.memory_space<smem>>) -> (i32, i32, i32) {
    %c0_i32 = arith.constant 0 : i32
    %c0_i32_0 = arith.constant 0 : i32
    %c0_i32_1 = arith.constant 0 : i32
    return %arg0, %c0_i32, %c0_i32_0 : i32, i32, i32
  }
  func.func @transform_1(%arg0: i32, %arg1: memref<2xi32, #tpu.memory_space<smem>>) -> (i32, i32, i32) {
    %c0_i32 = arith.constant 0 : i32
    %c0_i32_0 = arith.constant 0 : i32
    %c0_i32_1 = arith.constant 0 : i32
    return %arg0, %c0_i32, %c0_i32_0 : i32, i32, i32
  }
  func.func @transform_2(%arg0: i32, %arg1: memref<2xi32, #tpu.memory_space<smem>>) -> (i32, i32, i32) {
    %c0_i32 = arith.constant 0 : i32
    %c0_i32_0 = arith.constant 0 : i32
    %c0_i32_1 = arith.constant 0 : i32
    return %arg0, %c0_i32, %c0_i32_0 : i32, i32, i32
  }
  func.func @transform_3(%arg0: i32, %arg1: memref<2xi32, #tpu.memory_space<smem>>) -> (i32, i32, i32) {
    %c0_i32 = arith.constant 0 : i32
    %c0_i32_0 = arith.constant 0 : i32
    %c0_i32_1 = arith.constant 0 : i32
    %c0_i32_2 = arith.constant 0 : i32
    return %c0_i32, %c0_i32_0, %c0_i32_1 : i32, i32, i32
  }
  func.func @transform_4(%arg0: i32, %arg1: memref<2xi32, #tpu.memory_space<smem>>) -> (i32, i32) {
    %c0_i32 = arith.constant 0 : i32
    %c0_i32_0 = arith.constant 0 : i32
    %c0_i32_1 = arith.constant 0 : i32
    return %c0_i32, %c0_i32_0 : i32, i32
  }
  func.func @transform_5(%arg0: i32, %arg1: memref<2xi32, #tpu.memory_space<smem>>) -> (i32, i32, i32) {
    %c0_i32 = arith.constant 0 : i32
    %c0_i32_0 = arith.constant 0 : i32
    %c0_i32_1 = arith.constant 0 : i32
    %c0_i32_2 = arith.constant 0 : i32
    return %c0_i32, %c0_i32_0, %c0_i32_1 : i32, i32, i32
  }
  func.func @transform_6(%arg0: i32, %arg1: memref<2xi32, #tpu.memory_space<smem>>) -> (i32, i32) {
    %c0_i32 = arith.constant 0 : i32
    %c0_i32_0 = arith.constant 0 : i32
    %c0_i32_1 = arith.constant 0 : i32
    return %c0_i32, %c0_i32_0 : i32, i32
  }
  func.func @transform_7(%arg0: i32, %arg1: memref<2xi32, #tpu.memory_space<smem>>) -> (i32, i32, i32) {
    %c0_i32 = arith.constant 0 : i32
    %c0_i32_0 = arith.constant 0 : i32
    %c0_i32_1 = arith.constant 0 : i32
    return %arg0, %c0_i32, %c0_i32_0 : i32, i32, i32
  }
}

</mosaic_0001>

<bundles_post_ra>
// kernel: tpu_custom_call.1
= control target key start
LH: loop header
LB: loop body
LE: loop exit
PB: predicated region body
PF: predicated region fallthrough
CT: control target
= control target key end

     0   :  { %s1608_s0 = inlined_call_operand.vmem [shape: s32[2], index: 0, kind: input, shape index: {}]   ;;  %s1609_s1 = inlined_call_operand.vmem [shape: f32[2,16,8], index: 1, kind: input, shape index: {}]   ;;  %s1610_s2 = inlined_call_operand.vmem [shape: f32[2,16,8], index: 2, kind: input, shape index: {}]   ;;  %s1611_s3 = inlined_call_operand.vmem [shape: f32[2,16,32], index: 3, kind: input, shape index: {}]   ;;  %s1612_s4 = inlined_call_operand.vmem [shape: bf16[5,8,32], index: 4, kind: input, shape index: {}]   ;;  %s1613_s5 = inlined_call_operand.vmem [shape: f32[1,32], index: 5, kind: input, shape index: {}]   ;;  %s1614_s6 = inlined_call_operand.vmem [shape: bf16[5,8,32], index: 6, kind: input, shape index: {}]   ;;  %s1615_s7 = inlined_call_operand.vmem [shape: f32[1,32], index: 7, kind: input, shape index: {}]   ;;  %s1616_s8 = inlined_call_operand.hbm [shape: f32[2,16,32], index: 8, kind: output, shape index: {}]  }
   0x1   :  { %s13_s29 = sshll.u32 %s1608_s0, 4  ;;  %s14_s29 = int_to_ptr.vmem [resolvable:$true] %s13_s29 }
   0x2   :  { %s1222_s30 = scalar_lea.vmem %s14_s29, 16  ;;  %p1227_p1 = scmp.lt.s32.totalorder %s14_s29, %s14_s29 }
   0x3   :  { %p1223_p0 = scmp.ne.s32.totalorder %s14_s29, %s1222_s30  ;;  %p1228_p2 = scmp.lt.s32.totalorder %s1222_s30, %s1222_s30 }
   0x5   :  { %p1229_p3 = por %p1228_p2, %p1227_p1 }
   0x7   :  { %p1230_p4 = pnand %p1229_p3, %p1223_p0 }
   0x9   :  { %1233 = shalt.err (!%p1230_p4)  }
   0xa   :  { %s1300_s9 = smov [#allocation3]  }
   0xb   :  { %16 = dma.vmem_to_smem %s14_s29, 16, %s1300_s9, [#allocation2] }
   0xc   :  { %1278 = dma.done.wait [#allocation2], 16 }
   0xd   :  { %1279 = vsyncadd [#allocation2], 4294967280 }
   0xe   :  { %18 = sfence }
   0xf   :  { %19 = vsyncpa [#allocation5], 0 }
  0x10   :  { %21 = vsyncpa [#allocation5 + $0x1], 0  ;;  %s1354_s10 = smov 0   ;;  %s1356_s11 = smov 0  }
  0x11   :  { %s1358_s0 = smov 0   ;;  %s1360_s12 = smov 0  }
  0x12 LB: > { %s1375_s13 = sadd.s32 4294967295, %s1298_s12   ;;  %s1056_s14 = sadd.s32 4294967294, %s1298_s12   ;;  %s1298_s12 = sphi %s1360_s12, %s1622_s12   ;;  %s1294_s0 = sphi %s1358_s0, %s1621_s0   ;;  %s1290_s11 = sphi %s1356_s11, %s1620_s11   ;;  %s1286_s10 = sphi %s1354_s10, %s1619_s10  }
  0x13   : > { %s1379_s15 = sadd.s32 1, %s1298_s12   ;;  %s196_s16 = sadd.s32 1, %s1294_s0 }
  0x14   : > { %s193_s17 = ssub.s32 %s1298_s12, %s1379_s15  ;;  %p206_p5 = scmp.ne.s32.totalorder %s1294_s0, %s1290_s11 }
  0x15   : > { %p194_p6 = scmp.eq.s32.totalorder %s193_s17, 0  ;;  %p207_p7 = scmp.eq.s32.totalorder %s1375_s13, 1 }
  0x16   : > { %p212_p8 = scmp.ne.s32.totalorder %s1290_s11, %s1286_s10  ;;  %p213_p9 = scmp.eq.s32.totalorder %s1056_s14, 1 }
  0x17   : > { %s1390_s18 = scalar_select %p194_p6, %s1294_s0, %s196_s16  }
  0x18   : > { %p1392_p10 = por %p207_p7, %p206_p5  ;;  %p1396_p11 = por %p213_p9, %p212_p8 }
  0x19   : > { %p1059_p12 = scmp.ge.s32.totalorder %s1298_s12, 1  ;;  %p267_p13 = scmp.lt.s32.totalorder %s1298_s12, 3 }
  0x1b   : > { %p268_p0 = pnand %p1059_p12, %p267_p13 }
  0x1c   : > { %v1069_v0 = vld [vmem:[%s1612_s4 + $0x4] sm:$0xf] (!%p268_p0)  ;;  %vm372_vm0 = vcmask (!%p268_p0), 1043456   ;;  %v351_v1 = vld [vmem:[%s1612_s4] sm:$0xf] (!%p268_p0)  ;;  %v1301_v2 = vmov (!%p268_p0), 0.0  }
  0x1d   : > { %271 = sbr.rel (%p268_p0) target bundleno = 326 (0x146), region = 48  ;;  %1118 = vmatprep.subr.bf16.mxu0 (!%p268_p0), %v1301_v2  ;;  %1124 = vmatprep.subr.bf16.mxu1 (!%p268_p0), %v1301_v2  ;;  %v374_v3 = vsel (!%p268_p0), %vm372_vm0, %v1069_v0, 0  ;;  %v420_v4 = vsel (!%p268_p0), %vm372_vm0, %v351_v1, 0  ;;  %p309_p1 = scmp.lt.s32.totalorder (!%p268_p0), %s1375_s13, 1  ;;  %vm1302_vm1 = vmmov (!%p268_p0), 0   ;;  %vm341_vm2 = vcmask (!%p268_p0), 1041408  }
  0x1e   : > { %1119 = vmatpush3.bf16.msra.mxu0 (!%p268_p0), %v374_v3  ;;  %1125 = vmatpush3.bf16.msra.mxu1 (!%p268_p0), %v420_v4  ;;  %v1074_v5 = vld [vmem:[%s1612_s4 + $0xc] sm:$0xf] (!%p268_p0)  ;;  %vm368_vm3 = vcmask (!%p268_p0), 64512   ;;  %v1072_v34 = vld [vmem:[%s1612_s4 + $0x8] sm:$0xf] (!%p268_p0)  ;;  %vm467_vm6 = vcmask (!%p268_p0), 1046528  }
  0x1f   : > { %1126 = vmatprep.mubr.msk.bf16.mxu1 (!%p268_p0), %vm1302_vm1, %v1301_v2  ;;  %1120 = vmatprep.mubr.msk.bf16.mxu0 (!%p268_p0), %vm1302_vm1, %v1301_v2  ;;  %v536_v14 = vsel (!%p268_p0), %vm372_vm0, %v1074_v5, 0  ;;  %vm355_vm4 = vsmask.f32 (!%p268_p0), 7424  ;;  %vm522_vm5 = vsmask.f32 (!%p268_p0), 6400  ;;  %v475_v39 = vsel (!%p268_p0), %vm372_vm0, %v1072_v34, 0 }
  0x20   : > { %1130 = vmatprep.subr.bf16.mxu0 (!%p268_p0), %v1301_v2  ;;  %1136 = vmatprep.subr.bf16.mxu1 (!%p268_p0), %v1301_v2  ;;  %v1079_v38 = vld [vmem:[%s1614_s6 + $0x4] sm:$0xf] (!%p268_p0)  ;;  %v1076_v50 = vld [vmem:[%s1612_s4 + $0x10] sm:$0xf] (!%p268_p0)  ;;  %v1082_v54 = vld [vmem:[%s1614_s6 + $0x8] sm:$0xf] (!%p268_p0) }
  0x21   : > { %v678_v47 = vsel (!%p268_p0), %vm372_vm0, %v1079_v38, 0  ;;  %v591_v55 = vsel (!%p268_p0), %vm372_vm0, %v1076_v50, 0  ;;  %v778_v57 = vsel (!%p268_p0), %vm372_vm0, %v1082_v54, 0  ;;  %vm583_vm7 = vcmask (!%p268_p0), 1045504   ;;  %v658_v60 = vld [vmem:[%s1614_s6] sm:$0xf] (!%p268_p0) }
  0x22   : > { %v1086_v0 = vld [vmem:[%s1614_s6 + $0x10] sm:$0xf] (!%p268_p0)  ;;  %v724_v1 = vsel (!%p268_p0), %vm372_vm0, %v658_v60, 0  ;;  %s1539_s22 = sld [smem:[#allocation3 + %s1375_s13]] (!%p268_p0)  ;;  %s306_s23 = sand.u32 (!%p268_p0), 1, %s1290_s11   ;;  %vm953_vm10 = vcmask (!%p268_p0), 261120  }
  0x23   : > { %v892_v4 = vsel (!%p268_p0), %vm372_vm0, %v1086_v0, 0  ;;  %s1303_s27 = smov (!%p268_p0), [#allocation4]  }
  0x24   : > { %s310_s25 = scalar_select %p309_p1, %s1375_s13, 1 }
  0x25   : > { %s1238_s28 = sshll.u32 %s1303_s27, 4  ;;  %s1239_s28 = int_to_ptr.vmem [resolvable:$false] %s1238_s28 }
  0x26   : > { %s1420_s26 = sshll.u32 %s310_s25, 4 }
  0x27   : > { %s313_s29 = scalar_lea.vmem %s1609_s1, %s1420_s26  ;;  %s318_s14 = scalar_lea.vmem %s1610_s2, %s1420_s26 }
  0x28   : > { %v336_v6 = vld [vmem:[%s313_s29] sm:$0xff]  ;;  %v337_v7 = vld [vmem:[%s313_s29 + $0x8] sm:$0xff]  ;;  %s323_s9 = scalar_lea.vmem %s1611_s3, %s1420_s26  ;;  %s1097_s26 = sshll.u32 %s1375_s13, 8 }
  0x29   : > { %v644_v8 = vld [vmem:[%s318_s14] sm:$0xff]  ;;  %v342_v9 = vrot.slane %v336_v6, 6  ;;  %v343_v10 = vrot.slane %v337_v7, 6  ;;  %v645_v11 = vld [vmem:[%s318_s14 + $0x8] sm:$0xff]  ;;  %s1060_s14 = sshll.u32 %s306_s23, 4  ;;  %s1561_s24 = scalar_lea.hbm %s1616_s8, %s1097_s26 }
  0x2a   : > { %v649_v12 = vrot.slane %v644_v8, 6  ;;  %v650_v13 = vrot.slane %v645_v11, 6  ;;  %v1084_v6 = vld [vmem:[%s1614_s6 + $0xc] sm:$0xf]  ;;  %s308_s16 = scalar_lea.vmem [#allocation4], %s1060_s14  ;;  %s1567_s13 = scalar_lea.sflag [#allocation5], %s306_s23 }
  0x2b   : > { %v344_v15 = vsel %vm341_vm2, %v342_v9, %v343_v10  ;;  %v348_v16 = vsel %vm341_vm2, 0.0, %v342_v9  ;;  %v349_v18 = vsel %vm341_vm2, %v343_v10, 0.0  ;;  %s970_s17 = sshll.u32 %s308_s16, 4  ;;  %s1240_s29 = scalar_lea.vmem %s1239_s28, 512  ;;  %s1563_s17 = int_to_ptr.vmem [resolvable:$true] %s970_s17 }
  0x2c   : > { %v655_v17 = vsel %vm341_vm2, 0.0, %v649_v12  ;;  %v1438_v19 = vpack.c.bf16 %v344_v15, %v348_v16  ;;  %v1440_v20 = vpack.c.bf16 %v349_v18, %v349_v18  ;;  %v651_v21 = vsel %vm341_vm2, %v649_v12, %v650_v13  ;;  %s1234_s25 = scalar_lea.vmem %s1563_s17, 256  ;;  %p1241_p5 = scmp.lt.s32.totalorder %s1563_s17, %s1239_s28 }
  0x2d   : > { %v656_v22 = vsel %vm341_vm2, %v650_v13, 0.0  ;;  %v1444_v23 = vpack.c.bf16 %v651_v21, %v655_v17  ;;  %v838_v13 = vsel %vm372_vm0, %v1084_v6, 0  ;;  %p1235_p2 = scmp.ne.s32.totalorder %s1563_s17, %s1234_s25  ;;  %p1242_p6 = scmp.lt.s32.totalorder %s1240_s29, %s1234_s25 }
  0x2e   : > { %1127 = vmatmul.mubr.msk.bf16.vlgmr.msra.gmra.mrb[0].mxu1 %vm368_vm3, %v1438_v19  ;;  %v357_v24 = vshrl.u32 %v1438_v19, 16  ;;  %v359_v25 = vshll.u32 %v1438_v19, 16  ;;  %v364_v26 = vshll.u32 %v1440_v20, 16  ;;  %v526_v27 = vshrl.u32 %v1440_v20, 16 }
  0x2f   : > { %1137 = vmatpush3.bf16.msra.mxu1 %v536_v14  ;;  %1138 = vmatprep.mubr.msk.bf16.mxu1 %vm1302_vm1, %v1301_v2  ;;  %v1454_v28 = vpack.c.bf16 %v656_v22, %v656_v22  ;;  %v665_v29 = vshll.u32 %v1444_v23, 16  ;;  %v663_v43 = vshrl.u32 %v1444_v23, 16  ;;  %v468_v48 = vrot.slane %v1438_v19, 1  ;;  %p1236_p3 = pnand %p1235_p2, %p1392_p10  ;;  %p1243_p7 = por %p1242_p6, %p1241_p5 }
  0x30   : > { %v361_v30 = vrot.slane %v359_v25, 1  ;;  %v366_v31 = vrot.slane %v364_v26, 1  ;;  %v523_v32 = vrot.slane %v357_v24, 1  ;;  %v529_v33 = vrot.slane %v364_v26, 2  ;;  %1148 = vmatprep.subr.bf16.mxu1 %v1301_v2 }
  0x31   : > { %v524_v35 = vrot.slane %v359_v25, 2  ;;  %v528_v36 = vrot.slane %v526_v27, 1  ;;  %v667_v44 = vrot.slane %v665_v29, 1  ;;  %v670_v45 = vshll.u32 %v1454_v28, 16  ;;  %p1237_p4 = pneg %p1236_p3 }
  0x32   : > { %v362_v37 = vor.u32 %v361_v30, %v357_v24  ;;  %v469_v49 = vrot.slane %v1440_v20, 1  ;;  %v584_v58 = vrot.slane %v1438_v19, 2  ;;  %v585_v59 = vrot.slane %v1440_v20, 2 }
  0x33   : > { %v525_v40 = vor.u32 %v524_v35, %v523_v32  ;;  %v530_v41 = vor.u32 %v529_v33, %v528_v36  ;;  %v668_v51 = vor.u32 %v667_v44, %v663_v43  ;;  %v672_v52 = vrot.slane %v670_v45, 1  ;;  %p1244_p8 = pnand %p1243_p7, %p1237_p4 }
  0x34   : > { %v367_v42 = vsel %vm355_vm4, %v362_v37, %v366_v31  ;;  %v470_v53 = vsel %vm467_vm6, %v468_v48, %v469_v49  ;;  %v771_v61 = vrot.slane %v1444_v23, 1  ;;  %v772_v62 = vrot.slane %v1454_v28, 1 }
  0x35   : > { %1121 = vmatmul.mubr.msk.bf16.vlgmr.msra.gmra.mrb[0].mxu0 %vm368_vm3, %v367_v42  ;;  %v531_v46 = vsel %vm522_vm5, %v525_v40, %v530_v41  ;;  %v673_v56 = vsel %vm355_vm4, %v668_v51, %v672_v52  ;;  %v586_v63 = vsel %vm583_vm7, %v584_v58, %v585_v59  ;;  %v828_v5 = vshrl.u32 %v1454_v28, 16 }
  0x36   : > { %1131 = vmatpush3.bf16.msra.mxu0 %v475_v39  ;;  %1132 = vmatprep.mubr.msk.bf16.mxu0 %vm1302_vm1, %v1301_v2  ;;  %v773_v3 = vsel %vm467_vm6, %v771_v61, %v772_v62  ;;  %v885_v7 = vrot.slane %v1444_v23, 2  ;;  %v886_v8 = vrot.slane %v1454_v28, 2  ;;  %v825_v9 = vrot.slane %v663_v43, 1 }
  0x37   : > { %1139 = vmatmul.mubr.msk.bf16.vlgmr.msra.gmra.mrb[4].mxu1 %vm368_vm3, %v531_v46  ;;  %1142 = vmatprep.subr.bf16.mxu0 %v1301_v2  ;;  %v826_v10 = vrot.slane %v665_v29, 2  ;;  %v830_v11 = vrot.slane %v828_v5, 1  ;;  %v831_v12 = vrot.slane %v670_v45, 2  ;;  %v326_v61 = vlaneseq }
  0x38   : > { %1149 = vmatpush3.bf16.msra.mxu1 %v678_v47  ;;  %1150 = vmatprep.mubr.msk.bf16.mxu1 %vm1302_vm1, %v1301_v2  ;;  %v887_v14 = vsel %vm583_vm7, %v885_v7, %v886_v8  ;;  %v1078_v8 = vld [vmem:[%s1613_s5] ss:$0 sm:$0xff] }
  0x39   : > { %1160 = vmatprep.subr.bf16.mxu1 %v1301_v2  ;;  %v827_v15 = vor.u32 %v826_v10, %v825_v9  ;;  %v832_v16 = vor.u32 %v831_v12, %v830_v11  ;;  %v329_v9 = vstv %s1539_s22  ;;  %v1088_v10 = vld [vmem:[%s1615_s7] ss:$0 sm:$0xff] }
  0x3b   : > { %v833_v17 = vsel %vm522_vm5, %v827_v15, %v832_v16 }
  0x3d   : > { %1133 = vmatmul.mubr.msk.bf16.vlgmr.msra.gmra.mrb[4].mxu0 %vm368_vm3, %v470_v53 }
  0x3e   : > { %1143 = vmatpush3.bf16.msra.mxu0 %v591_v55  ;;  %1144 = vmatprep.mubr.msk.bf16.mxu0 %vm1302_vm1, %v1301_v2 }
  0x3f   : > { %1151 = vmatmul.mubr.msk.bf16.vlgmr.msra.gmra.mrb[8].mxu1 %vm368_vm3, %v673_v56  ;;  %1154 = vmatprep.subr.bf16.mxu0 %v1301_v2 }
  0x40   : > { %1161 = vmatpush3.bf16.msra.mxu1 %v778_v57  ;;  %1162 = vmatprep.mubr.msk.bf16.mxu1 %vm1302_vm1, %v1301_v2 }
  0x41   : > { %1172 = vmatprep.subr.bf16.mxu1 %v1301_v2 }
  0x45   : > { %1145 = vmatmul.mubr.msk.bf16.vlgmr.msra.gmra.mrb[8].mxu0 %vm368_vm3, %v586_v63 }
  0x46   : > { %1155 = vmatpush3.bf16.msra.mxu0 %v724_v1  ;;  %1156 = vmatprep.mubr.msk.bf16.mxu0 %vm1302_vm1, %v1301_v2 }
  0x47   : > { %1163 = vmatmul.mubr.msk.bf16.vlgmr.msra.gmra.mrb[12].mxu1 %vm368_vm3, %v773_v3  ;;  %1166 = vmatprep.subr.bf16.mxu0 %v1301_v2 }
  0x48   : > { %1173 = vmatpush3.bf16.msra.mxu1 %v892_v4  ;;  %1174 = vmatprep.mubr.msk.bf16.mxu1 %vm1302_vm1, %v1301_v2  ;;  %v327_v4 = vshrl.u32 %v326_v61, 7 }
  0x4a   : > { %vm330_vm8 = vcmp.lt.s32.totalorder %v327_v4, %v329_v9 }
  0x4d   : > { %1157 = vmatmul.mubr.msk.bf16.vlgmr.msra.gmra.mrb[12].mxu0 %vm368_vm3, %v1444_v23 }
  0x4e   : > { %1167 = vmatpush3.bf16.msra.mxu0 %v838_v13  ;;  %1168 = vmatprep.mubr.msk.bf16.mxu0 %vm1302_vm1, %v1301_v2  ;;  %v328_v13 = vadd.s32 8, %v327_v4 }
  0x4f   : > { %1175 = vmatmul.mubr.msk.bf16.vlgmr.msra.gmra.mrb[16].mxu1 %vm368_vm3, %v887_v14 }
  0x50   : > { %vm331_vm9 = vcmp.lt.s32.totalorder %v328_v13, %v329_v9 }
  0x55   : > { %1169 = vmatmul.mubr.msk.bf16.vlgmr.msra.gmra.mrb[16].mxu0 %vm368_vm3, %v833_v17 }
 0x101   : > { %v456_v18 = vpop.f32.mrb[0].mxu1 }
 0x102   : > { %v1128_v19 = vpop.f32.mrb[1].mxu1 }
 0x103   : > { %v459_v20 = vpop.f32.mrb[2].mxu1  ;;  %v947_v19 = vld [vmem:[%s323_s9] sm:$0xff] }
 0x104   : > { %v1129_v21 = vpop.f32.mrb[3].mxu1 }
 0x108   : > { %v410_v22 = vpop.f32.mrb[0].mxu0 }
 0x109   : > { %v457_v24 = vadd.f32 %v456_v18, %v410_v22  ;;  %v1122_v25 = vpop.f32.mrb[1].mxu0 }
 0x10a   : > { %v413_v23 = vpop.f32.mrb[2].mxu0  ;;  %v572_v26 = vpop.f32.mrb[4].mxu1  ;;  %v948_v25 = vld [vmem:[%s323_s9 + $0x8] sm:$0xff] }
 0x10b   : > { %v460_v27 = vadd.f32 %v459_v20, %v413_v23  ;;  %v1123_v28 = vpop.f32.mrb[3].mxu0  ;;  %v1140_v29 = vpop.f32.mrb[5].mxu1 }
 0x10c   : > { %v575_v30 = vpop.f32.mrb[6].mxu1 }
 0x10d   : > { %v1141_v31 = vpop.f32.mrb[7].mxu1 }
 0x110   : > { %v511_v32 = vpop.f32.mrb[4].mxu0 }
 0x111   : > { %v518_v33 = vadd.f32 %v511_v32, %v457_v24  ;;  %v1134_v34 = vpop.f32.mrb[5].mxu0  ;;  %v1067_v24 = vsel %vm330_vm8, 1.0, %v1301_v2 }
 0x112   : > { %v514_v35 = vpop.f32.mrb[6].mxu0  ;;  %v714_v36 = vpop.f32.mrb[8].mxu1 }
 0x113   : > { %v519_v37 = vadd.f32 %v514_v35, %v460_v27  ;;  %v1135_v38 = vpop.f32.mrb[7].mxu0  ;;  %v579_v39 = vadd.f32 %v572_v26, %v518_v33  ;;  %v1152_v40 = vpop.f32.mrb[9].mxu1  ;;  %v1068_v27 = vsel %vm331_vm9, 1.0, %v1301_v2 }
 0x114   : > { %v717_v41 = vpop.f32.mrb[10].mxu1 }
 0x115   : > { %v580_v42 = vadd.f32 %v575_v30, %v519_v37  ;;  %v1153_v43 = vpop.f32.mrb[11].mxu1 }
 0x118   : > { %v627_v44 = vpop.f32.mrb[8].mxu0 }
 0x119   : > { %v634_v45 = vadd.f32 %v627_v44, %v579_v39  ;;  %v1146_v46 = vpop.f32.mrb[9].mxu0 }
 0x11a   : > { %v630_v47 = vpop.f32.mrb[10].mxu0  ;;  %v814_v48 = vpop.f32.mrb[12].mxu1 }
 0x11b   : > { %v635_v49 = vadd.f32 %v630_v47, %v580_v42  ;;  %v1147_v50 = vpop.f32.mrb[11].mxu0  ;;  %v1164_v51 = vpop.f32.mrb[13].mxu1  ;;  %v642_v16 = vadd.f32 %v1078_v8, %v634_v45 }
 0x11c   : > { %v817_v52 = vpop.f32.mrb[14].mxu1 }
 0x11d   : > { %v1165_v53 = vpop.f32.mrb[15].mxu1  ;;  %v643_v20 = vadd.f32 %v1078_v8, %v635_v49 }
 0x120   : > { %v760_v54 = vpop.f32.mrb[12].mxu0 }
 0x121   : > { %v761_v55 = vadd.f32 %v760_v54, %v714_v36  ;;  %v1158_v56 = vpop.f32.mrb[13].mxu0 }
 0x122   : > { %v763_v57 = vpop.f32.mrb[14].mxu0  ;;  %v928_v58 = vpop.f32.mrb[16].mxu1 }
 0x123   : > { %v764_v59 = vadd.f32 %v763_v57, %v717_v41  ;;  %v1159_v60 = vpop.f32.mrb[15].mxu0  ;;  %v821_v62 = vadd.f32 %v814_v48, %v761_v55  ;;  %v1176_v63 = vpop.f32.mrb[17].mxu1 }
 0x124   : > { %v931_v0 = vpop.f32.mrb[18].mxu1 }
 0x125   : > { %v822_v1 = vadd.f32 %v817_v52, %v764_v59  ;;  %v1177_v3 = vpop.f32.mrb[19].mxu1 }
 0x128   : > { %v874_v5 = vpop.f32.mrb[16].mxu0 }
 0x129   : > { %v881_v6 = vadd.f32 %v874_v5, %v821_v62  ;;  %v1170_v7 = vpop.f32.mrb[17].mxu0 }
 0x12a   : > { %v877_v11 = vpop.f32.mrb[18].mxu0 }
 0x12b   : > { %v935_v12 = vadd.f32 %v928_v58, %v881_v6  ;;  %v882_v14 = vadd.f32 %v877_v11, %v822_v1  ;;  %v1171_v15 = vpop.f32.mrb[19].mxu0 }
 0x12d   : > { %v943_v17 = vadd.f32 %v1088_v10, %v935_v12  ;;  %v936_v18 = vadd.f32 %v931_v0, %v882_v14 }
 0x12f   : > { %v945_v21 = vadd.f32 %v943_v17, %v642_v16  ;;  %v944_v22 = vadd.f32 %v1088_v10, %v936_v18 }
 0x131   : > { %v949_v23 = vadd.f32 %v947_v19, %v945_v21  ;;  %v946_v26 = vadd.f32 %v944_v22, %v643_v20 }
 0x133   : > { %v951_v28 = vmul.f32 %v1067_v24, %v949_v23  ;;  %v950_v29 = vadd.f32 %v948_v25, %v946_v26 }
 0x135   : > { %v952_v30 = vmul.f32 %v1068_v27, %v950_v29  ;;  %954 = vst.msk [vmem:[%s308_s16] sm:$0xff] %vm953_vm10, %v951_v28 }
 0x137   : > { %955 = vst.msk [vmem:[%s308_s16 + $0x8] sm:$0xff] %vm953_vm10, %v952_v30 }
 0x138   : > { %1247 = shalt.err (!%p1244_p8)
}
 0x139   : > { %s1248_s23 = scalar_lea.hbm %s1561_s24, 256  ;;  %s1252_s14 = scalar_lea.hbm %s1616_s8, 512 }
 0x13a   : > { %p1249_p9 = scmp.ne.s32.totalorder %s1561_s24, %s1248_s23  ;;  %p1253_p0 = scmp.lt.u32.totalorder %s1561_s24, %s1616_s8 }
 0x13b   : > { %p1254_p1 = scmp.lt.u32.totalorder %s1252_s14, %s1248_s23  ;;  %p1256_p3 = scmp.lt.u32.totalorder %s1248_s23, %s1561_s24 }
 0x13c   : > { %p1250_p12 = pnand %p1249_p9, %p1392_p10 }
 0x13d   : > { %p1255_p2 = por %p1254_p1, %p1253_p0 }
 0x13e   : > { %p1251_p13 = pneg %p1250_p12 }
 0x13f   : > { %p1257_p4 = por %p1256_p3, %p1255_p2 }
 0x141   : > { %p1258_p5 = pnand %p1257_p4, %p1251_p13 }
 0x143   : > { %1261 = shalt.err (!%p1258_p5)
}
 0x144   : > { %s1304_s21 = smov 128   ;;  %s1305_s22 = smov 8  }
 0x145   : > { %1178 = dma.vmem_to_hbm [thread:$0]  (%p1392_p10), %s1563_s17, 256, %s1561_s24, %s1567_s13, %s1304_s21, %s1304_s21, %s1305_s22  }
 0x146 PF: > { %p1184_p6 = scmp.ge.s32.totalorder %s1298_s12, 2  ;;  %s985_s25 = sand.u32 1, %s1286_s10  }
 0x147   : > { %s986_s27 = scalar_lea.sflag [#allocation5], %s985_s25 }
 0x148   : > { %p1181_p7 = pnand %p1184_p6, %p1396_p11 }
 0x14a   : > { %1281 = dma.done.wait (!%p1181_p7), %s986_s27, 256  }
 0x14b   : > { %1283 = vsyncadd (!%p1181_p7), %s986_s27, 4294967040  ;;  %p24_p8 = scmp.ge.s32.totalorder %s1379_s15, 4   ;;  %s1619_s10 = smov %s1290_s11 }
 0x14c   : > { %s1620_s11 = smov %s1294_s0  ;;  %s1621_s0 = smov %s1390_s18 }
 0x14d   : > { %s1622_s12 = smov %s1379_s15  ;;  %26 = sbr.rel (!%p24_p8) target bundleno = 18 (0x12), region = 97 }
 0x154   :  { %991 = vsyncpa [#allocation5], 1 }
 0x155   :  { %993 = vsyncpa [#allocation5 + $0x1], 1 }

</bundles_post_ra>
